<compile_context>
chip_gen: v5e
topology: v5e:2x2
jax: 0.10.0
libtpu: 0.0.40
codegen_flags: <defaults>
</compile_context>

<pallas_src>
import jax
import jax.numpy as jnp
from jax import lax
from jax.experimental import pallas as pl
from jax.experimental.pallas import tpu as pltpu


def _round_up(x, m):
    return ((x + m - 1) // m) * m


def _sublane_unit(dtype):
    itemsize = jnp.dtype(dtype).itemsize
    return {4: 8, 2: 16, 1: 32}.get(itemsize, 8)


def _tile_candidates(dim_padded, unit):
    """Multiples of `unit` that exactly divide dim_padded (descending)."""
    n = dim_padded // unit
    return [d * unit for d in range(n, 0, -1) if n % d == 0]


def _vmem_limit_bytes():
    # Derive the scoped-VMEM request from the actual chip; leave headroom for
    # compiler-internal scratch / semaphores (never request the full physical
    # VMEM -- on v7x that is only 64 MiB per TensorCore).
    phys = 64 * 1024 * 1024  # conservative fallback = smallest per-TC VMEM (v7x)
    try:
        info = pltpu.get_tpu_info()
        phys = int(getattr(info, "vmem_capacity_bytes", phys))
    except Exception:
        pass
    limit = min(phys * 3 // 4, phys - 16 * 1024 * 1024)
    return max(int(limit), 16 * 1024 * 1024)


def _choose_tiles(Mp, Kp, Np, x_item, w_item, b_item, o_item,
                  tm_unit, budget, use_scratch):
    """Pick (TM, TN, TK) that fit `budget` bytes and minimize HBM re-streams."""
    best, best_score = None, None
    for TM in _tile_candidates(Mp, tm_unit):
        for TN in _tile_candidates(Np, 128):
            for TK in _tile_candidates(Kp, 128):
                fp = (2 * TM * TK * x_item        # double-buffered x tiles
                      + 2 * TN * TK * w_item      # double-buffered weight tiles
                      + 2 * 8 * TN * b_item       # double-buffered bias (sublane-padded)
                      + 2 * TM * TN * o_item)     # double-buffered output tile
                if use_scratch:
                    fp += TM * TN * 4              # f32 accumulator scratch
                if fp > budget:
                    continue
                m_t, n_t, k_t = Mp // TM, Np // TN, Kp // TK
                # HBM traffic (bytes): weight re-streamed per M-tile, x per N-tile.
                traffic = Np * Kp * m_t * w_item + Mp * Kp * n_t * x_item
                steps = m_t * n_t * k_t            # ~0.35 us fixed cost per step
                score = traffic + steps * 400_000
                if best_score is None or score < best_score:
                    best, best_score = (TM, TN, TK), score
    if best is None:  # degenerate fallback; smallest legal tiles always fit in practice
        best = (min(Mp, tm_unit), min(Np, 128), min(Kp, 128))
    return best


def _linear_relu_kernel_f32(x_ref, w_ref, b_ref, o_ref):
    # f32-output fast path: accumulate directly into the resident output block
    # (its block index is constant across the K axis), no scratch, no final copy.
    # x_ref: [TM, TK]   w_ref: [TN, TK] (PyTorch layout, contracted over K)
    # b_ref: [1, TN]    o_ref: [TM, TN] f32
    k = pl.program_id(2)

    @pl.when(k == 0)
    def _():
        o_ref[...] = jnp.zeros_like(o_ref)

    o_ref[...] += lax.dot_general(
        x_ref[...], w_ref[...],
        dimension_numbers=(((1,), (1,)), ((), ())),
        preferred_element_type=jnp.float32)

    @pl.when(k == pl.num_programs(2) - 1)
    def _():
        o_ref[...] = jnp.maximum(o_ref[...] + b_ref[...].astype(jnp.float32), 0.0)


def _linear_relu_kernel_acc(x_ref, w_ref, b_ref, o_ref, acc_ref):
    # Narrow-output path (bf16 etc.): f32 accumulator scratch, cast on finalize.
    k = pl.program_id(2)

    @pl.when(k == 0)
    def _():
        acc_ref[...] = jnp.zeros_like(acc_ref)

    acc_ref[...] += lax.dot_general(
        x_ref[...], w_ref[...],
        dimension_numbers=(((1,), (1,)), ((), ())),
        preferred_element_type=jnp.float32)

    @pl.when(k == pl.num_programs(2) - 1)
    def _():
        acc = acc_ref[...] + b_ref[...].astype(jnp.float32)
        o_ref[...] = jnp.maximum(acc, 0.0).astype(o_ref.dtype)


def linear_relu(x, weight, bias=None):
    """y = ReLU(x @ weight.T + bias).

    x: [B, in_f]; weight: [out_f, in_f] (PyTorch nn.Linear layout); bias: [out_f] or None.
    """
    B, in_f = x.shape
    out_f, in_f_w = weight.shape
    assert in_f_w == in_f, "weight must be [out_features, in_features]"
    if bias is None:
        # bias=False path: zero bias keeps a single kernel; the (1, TN) DMA is tiny.
        bias = jnp.zeros((out_f,), dtype=x.dtype)

    out_dtype = x.dtype
    x_item = jnp.dtype(x.dtype).itemsize
    w_item = jnp.dtype(weight.dtype).itemsize
    b_item = jnp.dtype(bias.dtype).itemsize
    o_item = jnp.dtype(out_dtype).itemsize

    tm_unit = _sublane_unit(x.dtype)

    # Pad only to hardware-minimum tile units (<=127 lanes / <=tm_unit-1 rows).
    Mp = _round_up(B, tm_unit)
    Kp = _round_up(in_f, 128)
    Np = _round_up(out_f, 128)

    use_scratch = out_dtype != jnp.float32
    vmem_limit = _vmem_limit_bytes()
    budget = vmem_limit - 4 * 1024 * 1024  # headroom for compiler scratch/semaphores
    TM, TN, TK = _choose_tiles(Mp, Kp, Np, x_item, w_item, b_item, o_item,
                               tm_unit, budget, use_scratch)

    x_p = x if (Mp == B and Kp == in_f) else jnp.pad(
        x, ((0, Mp - B), (0, Kp - in_f)))
    w_p = weight if (Np == out_f and Kp == in_f) else jnp.pad(
        weight, ((0, Np - out_f), (0, Kp - in_f)))
    b_p = bias if Np == out_f else jnp.pad(bias, (0, Np - out_f))
    b2d = b_p.reshape(1, Np)

    # N leads the grid: on v7x the two TensorCores shard the leading parallel
    # axis, so N-sharding splits the dominant weight HBM traffic between cores.
    grid = (Np // TN, Mp // TM, Kp // TK)

    cost = pl.CostEstimate(
        flops=2 * Mp * Kp * Np,
        transcendentals=0,
        bytes_accessed=(x_p.size * x_item + w_p.size * w_item
                        + b2d.size * b_item + Mp * Np * o_item))

    in_specs = [
        pl.BlockSpec((TM, TK), lambda j, i, k: (i, k)),   # x tile
        pl.BlockSpec((TN, TK), lambda j, i, k: (j, k)),   # weight tile (PyTorch layout)
        pl.BlockSpec((1, TN), lambda j, i, k: (0, j)),    # bias slice
    ]
    out_spec = pl.BlockSpec((TM, TN), lambda j, i, k: (i, j))

    kernel = _linear_relu_kernel_acc if use_scratch else _linear_relu_kernel_f32
    scratch = [pltpu.VMEM((TM, TN), jnp.float32)] if use_scratch else []

    out_p = pl.pallas_call(
        kernel,
        out_shape=jax.ShapeDtypeStruct((Mp, Np), out_dtype),
        grid_spec=pltpu.PrefetchScalarGridSpec(
            num_scalar_prefetch=0,
            grid=grid,
            in_specs=in_specs,
            out_specs=out_spec,
            scratch_shapes=scratch,
        ),
        compiler_params=pltpu.CompilerParams(
            dimension_semantics=("parallel", "parallel", "arbitrary"),
            vmem_limit_bytes=vmem_limit),
        cost_estimate=cost,
    )(x_p, w_p, b2d)

    if Mp == B and Np == out_f:
        return out_p
    return out_p[:B, :out_f]


def linear_relu_ref(x, weight, bias):
    return jnp.maximum(x @ weight.T + bias[None, :], 0.0)


if __name__ == "__main__":
    key = jax.random.PRNGKey(0)
    k_x, k_w, k_b = jax.random.split(key, 3)

    B, in_features, out_features = 8, 32, 64

    x = jax.random.normal(k_x, (B, in_features), dtype=jnp.float32)
    # Deterministic synthetic params (shapes match nn.Linear(in_features, out_features))
    weight = jax.random.normal(k_w, (out_features, in_features), dtype=jnp.float32) * 0.1
    bias = jax.random.normal(k_b, (out_features,), dtype=jnp.float32) * 0.1

    out = linear_relu(x, weight, bias)
    out = jax.block_until_ready(out)

    ref = linear_relu_ref(x, weight, bias)
    assert out.shape == (B, out_features)
    assert jnp.allclose(out, ref, atol=1e-5, rtol=1e-5), "mismatch vs reference"

    print("KERNEL_OK")
</pallas_src>

<mosaic_0001>
module attributes {stable_mosaic.version = 11 : i64} {
  func.func @_linear_relu_kernel_f32(%arg0: i32, %arg1: i32, %arg2: i32, %arg3: memref<8x128xf32, #tpu.memory_space<vmem>>, %arg4: memref<128x128xf32, #tpu.memory_space<vmem>>, %arg5: memref<1x128xf32, #tpu.memory_space<vmem>>, %arg6: memref<8x128xf32, #tpu.memory_space<vmem>>) attributes {dimension_semantics = [#tpu.dimension_semantics<parallel>, #tpu.dimension_semantics<parallel>, #tpu.dimension_semantics<arbitrary>], iteration_bounds = array<i64: 1, 1, 1>, scalar_prefetch = 0 : i64, scratch_operands = 0 : i64, tpu.core_type = #tpu.core_type<tc>, window_params = [{transform_indices = @transform_0, window_bounds = array<i64: 8, 128>}, {transform_indices = @transform_1, window_bounds = array<i64: 128, 128>}, {transform_indices = @transform_2, window_bounds = array<i64: 1, 128>}, {transform_indices = @transform_3, window_bounds = array<i64: 8, 128>}]} {
    %c0_i32 = arith.constant 0 : i32
    %0 = arith.cmpi eq, %arg2, %c0_i32 : i32
    %1 = arith.extui %0 : i1 to i32
    %c0_i32_0 = arith.constant 0 : i32
    %2 = arith.cmpi ne, %1, %c0_i32_0 : i32
    scf.if %2 {
      %cst_10 = arith.constant 0.000000e+00 : f32
      %12 = vector.broadcast %cst_10 : f32 to vector<8x128xf32>
      %c0_11 = arith.constant 0 : index
      %c0_12 = arith.constant 0 : index
      %13 = vector.load %arg6[%c0_11, %c0_12] : memref<8x128xf32, #tpu.memory_space<vmem>>, vector<8x128xf32>
      tpu.vector_store %arg6[%c0_11, %c0_12], %12 {strides = array<i32>} : memref<8x128xf32, #tpu.memory_space<vmem>>, vector<8x128xf32>,
    } else {
    }
    %c0 = arith.constant 0 : index
    %c0_1 = arith.constant 0 : index
    %3 = vector.load %arg6[%c0, %c0_1] : memref<8x128xf32, #tpu.memory_space<vmem>>, vector<8x128xf32>
    %c0_2 = arith.constant 0 : index
    %c0_3 = arith.constant 0 : index
    %4 = vector.load %arg3[%c0_2, %c0_3] : memref<8x128xf32, #tpu.memory_space<vmem>>, vector<8x128xf32>
    %c0_4 = arith.constant 0 : index
    %c0_5 = arith.constant 0 : index
    %5 = vector.load %arg4[%c0_4, %c0_5] : memref<128x128xf32, #tpu.memory_space<vmem>>, vector<128x128xf32>
    %cst = arith.constant dense<0.000000e+00> : vector<8x128xf32>
    %6 = tpu.matmul %4, %5, %cst {dimension_numbers = #tpu.dot_dimension_numbers<[1], [1], [0], [0], [0, 0, 1, 0], [], []>} : vector<8x128xf32>, vector<128x128xf32>, vector<8x128xf32> -> vector<8x128xf32>
    %7 = arith.addf %3, %6 : vector<8x128xf32>
    %c0_6 = arith.constant 0 : index
    %c0_7 = arith.constant 0 : index
    %8 = vector.load %arg6[%c0_6, %c0_7] : memref<8x128xf32, #tpu.memory_space<vmem>>, vector<8x128xf32>
    tpu.vector_store %arg6[%c0_6, %c0_7], %7 {strides = array<i32>} : memref<8x128xf32, #tpu.memory_space<vmem>>, vector<8x128xf32>,
    %c0_i32_8 = arith.constant 0 : i32
    %9 = arith.cmpi eq, %arg2, %c0_i32_8 : i32
    %10 = arith.extui %9 : i1 to i32
    %c0_i32_9 = arith.constant 0 : i32
    %11 = arith.cmpi ne, %10, %c0_i32_9 : i32
    scf.if %11 {
      %c0_10 = arith.constant 0 : index
      %c0_11 = arith.constant 0 : index
      %12 = vector.load %arg6[%c0_10, %c0_11] : memref<8x128xf32, #tpu.memory_space<vmem>>, vector<8x128xf32>
      %c0_12 = arith.constant 0 : index
      %c0_13 = arith.constant 0 : index
      %13 = vector.load %arg5[%c0_12, %c0_13] : memref<1x128xf32, #tpu.memory_space<vmem>>, vector<1x128xf32>
      %14 = vector.broadcast %13 : vector<1x128xf32> to vector<8x128xf32>
      %15 = arith.addf %12, %14 : vector<8x128xf32>
      %cst_14 = arith.constant 0.000000e+00 : f32
      %16 = vector.broadcast %cst_14 : f32 to vector<8x128xf32>
      %17 = arith.maximumf %15, %16 : vector<8x128xf32>
      %c0_15 = arith.constant 0 : index
      %c0_16 = arith.constant 0 : index
      %18 = vector.load %arg6[%c0_15, %c0_16] : memref<8x128xf32, #tpu.memory_space<vmem>>, vector<8x128xf32>
      tpu.vector_store %arg6[%c0_15, %c0_16], %17 {strides = array<i32>} : memref<8x128xf32, #tpu.memory_space<vmem>>, vector<8x128xf32>,
    } else {
    }
    return
  }
  func.func @transform_0(%arg0: i32, %arg1: i32, %arg2: i32) -> (i32, i32) {
    %c0_i32 = arith.constant 0 : i32
    return %arg1, %arg2 : i32, i32
  }
  func.func @transform_1(%arg0: i32, %arg1: i32, %arg2: i32) -> (i32, i32) {
    %c0_i32 = arith.constant 0 : i32
    return %arg0, %arg2 : i32, i32
  }
  func.func @transform_2(%arg0: i32, %arg1: i32, %arg2: i32) -> (i32, i32) {
    %c0_i32 = arith.constant 0 : i32
    %c0_i32_0 = arith.constant 0 : i32
    return %c0_i32, %arg0 : i32, i32
  }
  func.func @transform_3(%arg0: i32, %arg1: i32, %arg2: i32) -> (i32, i32) {
    %c0_i32 = arith.constant 0 : i32
    return %arg1, %arg0 : i32, i32
  }
}

</mosaic_0001>

<bundles_post_ra>
// kernel: tpu_custom_call.1
= control target key start
LH: loop header
LB: loop body
LE: loop exit
PB: predicated region body
PF: predicated region fallthrough
CT: control target
= control target key end

     0   :  { %8 = vsyncpa [#allocation3], 0  ;;  %s241_s0 = inlined_call_operand.hbm [shape: f32[8,128], index: 0, kind: input, shape index: {}]   ;;  %s242_s1 = inlined_call_operand.hbm [shape: f32[128,128], index: 1, kind: input, shape index: {}]   ;;  %s243_s2 = inlined_call_operand.vmem [shape: f32[1,128], index: 2, kind: input, shape index: {}]   ;;  %s244_s3 = inlined_call_operand.hbm [shape: f32[8,128], index: 3, kind: output, shape index: {}]  }
   0x1   :  { %9 = vsyncpa [#allocation6], 0 }
   0x2   :  { %10 = vsyncpa [#allocation4], 0  ;;  %s16_s14 = sshll.u32 %s241_s0, 4  ;;  %s204_s15 = smov [#allocation2]   ;;  %s17_s14 = int_to_ptr.hbm [resolvable:$true] %s16_s14 }
   0x3   :  { %s18_s16 = sshll.u32 %s204_s15, 4  ;;  %s26_s19 = sshll.u32 %s242_s1, 4  ;;  %s19_s16 = int_to_ptr.vmem [resolvable:$true] %s18_s16  ;;  %s27_s19 = int_to_ptr.hbm [resolvable:$true] %s26_s19 }
   0x4   :  { %21 = dma.hbm_to_vmem [thread:$0]  %s17_s14, 128, %s19_s16, [#allocation3]  }
   0x5   :  { %s205_s20 = smov [#allocation5]   ;;  %s206_s22 = smov 128  }
   0x6   :  { %s28_s21 = sshll.u32 %s205_s20, 4  ;;  %s207_s23 = smov 8   ;;  %s29_s21 = int_to_ptr.vmem [resolvable:$true] %s28_s21 }
   0x7   :  { %34 = dma.hbm_to_vmem [thread:$0]  %s27_s19, 2048, %s29_s21, [#allocation6], %s206_s22, %s206_s22, %s207_s23  }
   0x8   :  { %198 = dma.done.wait [#allocation3], 128  }
   0x9   :  { %199 = vsyncadd [#allocation3], 4294967168 }
   0xa   :  { %200 = dma.done.wait [#allocation6], 2048  }
   0xb   :  { %201 = vsyncadd [#allocation6], 4294965248  ;;  %v67_v0 = vld [vmem:[#allocation5 + $0x78] sm:$0xff]  ;;  %v66_v1 = vld [vmem:[#allocation5 + $0x70] sm:$0xff]  ;;  %s208_s24 = smov [#allocation7]   ;;  %s108_s28 = sshll.u32 %s244_s3, 4  ;;  %s109_s28 = int_to_ptr.hbm [resolvable:$true] %s108_s28 }
   0xc   :  { %68 = vmatpush.xpose.msra.mxu0 %v67_v0  ;;  %v65_v2 = vld [vmem:[#allocation5 + $0x68] sm:$0xff]  ;;  %v64_v3 = vld [vmem:[#allocation5 + $0x60] sm:$0xff]  ;;  %v63_v4 = vld [vmem:[#allocation5 + $0x58] sm:$0xff]  ;;  %s106_s25 = sshll.u32 %s208_s24, 4  ;;  %s107_s25 = int_to_ptr.vmem [resolvable:$true] %s106_s25 }
   0xd   :  { %v62_v5 = vld [vmem:[#allocation5 + $0x50] sm:$0xff]  ;;  %v61_v6 = vld [vmem:[#allocation5 + $0x48] sm:$0xff]  ;;  %v60_v7 = vld [vmem:[#allocation5 + $0x40] sm:$0xff] }
   0xe   :  { %v59_v8 = vld [vmem:[#allocation5 + $0x38] sm:$0xff]  ;;  %v58_v9 = vld [vmem:[#allocation5 + $0x30] sm:$0xff]  ;;  %v57_v10 = vld [vmem:[#allocation5 + $0x28] sm:$0xff] }
   0xf   :  { %v56_v11 = vld [vmem:[#allocation5 + $0x20] sm:$0xff]  ;;  %v55_v12 = vld [vmem:[#allocation5 + $0x18] sm:$0xff]  ;;  %v54_v13 = vld [vmem:[#allocation5 + $0x10] sm:$0xff] }
  0x10   :  { %69 = vmatpush.xpose.msra.mxu0 %v66_v1  ;;  %v53_v14 = vld [vmem:[#allocation5 + $0x8] sm:$0xff]  ;;  %v52_v15 = vld [vmem:[#allocation5] sm:$0xff]  ;;  %v51_v16 = vld [vmem:[#allocation2] sm:$0xff] }
  0x11   :  { %v125_v17 = vld [vmem:[%s243_s2] ss:$0 sm:$0xff] }
  0x14   :  { %70 = vmatpush.xpose.msra.mxu0 %v65_v2 }
  0x18   :  { %71 = vmatpush.xpose.msra.mxu0 %v64_v3 }
  0x1c   :  { %72 = vmatpush.xpose.msra.mxu0 %v63_v4 }
  0x20   :  { %73 = vmatpush.xpose.msra.mxu0 %v62_v5 }
  0x24   :  { %74 = vmatpush.xpose.msra.mxu0 %v61_v6 }
  0x28   :  { %75 = vmatpush.xpose.msra.mxu0 %v60_v7 }
  0x2c   :  { %76 = vmatpush.xpose.msra.mxu0 %v59_v8 }
  0x30   :  { %77 = vmatpush.xpose.msra.mxu0 %v58_v9 }
  0x34   :  { %78 = vmatpush.xpose.msra.mxu0 %v57_v10 }
  0x38   :  { %79 = vmatpush.xpose.msra.mxu0 %v56_v11 }
  0x3c   :  { %80 = vmatpush.xpose.msra.mxu0 %v55_v12 }
  0x40   :  { %81 = vmatpush.xpose.msra.mxu0 %v54_v13 }
  0x44   :  { %82 = vmatpush.xpose.msra.mxu0 %v53_v14 }
  0x48   :  { %83 = vmatpush.xpose.msra.mxu0 %v52_v15 }
  0x4b   :  { %84 = vmatmul.f32.vlgmr.msra.gmra.mxu0 %v51_v16 }
  0xc8   :  { %v85_v18 = vpop.f32.mrf.mxu0 }
  0xc9   :  { %v98_v19 = vadd.f32 %v125_v17, %v85_v18 }
  0xcb   :  { %v99_v20 = vmax.f32 %v98_v19, 0.0 }
  0xcd   :  { %100 = vst [vmem:[#allocation7] sm:$0xff] %v99_v20 }
  0xce   :  { %111 = dma.vmem_to_hbm [thread:$0]  %s107_s25, 128, %s109_s28, [#allocation4]  }
  0xcf   :  { %202 = dma.done.wait [#allocation4], 128  }
  0xd0   :  { %203 = vsyncadd [#allocation4], 4294967168 }
  0xd1   :  { %116 = vsyncpa [#allocation3], 1 }
  0xd2   :  { %117 = vsyncpa [#allocation6], 1 }
  0xd3   :  { %118 = vsyncpa [#allocation4], 1 }

</bundles_post_ra>
